<compile_context>
chip_gen: v7x
topology: tpu7x:2x2x1
jax: 0.10.0
libtpu: 0.0.40
codegen_flags: <defaults>
</compile_context>

<pallas_src>
import jax
import jax.numpy as jnp
from jax.experimental import pallas as pl
from jax.experimental.pallas import tpu as pltpu


# ----------------------------- kernels ------------------------------------ #

def _gcn_g_kernel(adj_ref, w1_ref, b1_ref, g_ref):
    """g = adj @ relu(adj @ W1 + b1)   (single grid step, everything resident)."""
    s1 = jnp.dot(adj_ref[...], w1_ref[...], preferred_element_type=jnp.float32)
    h = jnp.maximum(s1 + b1_ref[...], 0.0)
    # TODO(synk): nn.Dropout(p=0.3) is identity at inference; training-mode
    # dropout (with torch RNG semantics) is not reproduced here.
    g = jnp.dot(adj_ref[...], h.astype(jnp.bfloat16),
                preferred_element_type=jnp.float32)
    g_ref[...] = g.astype(g_ref.dtype)


def _gcn_out_kernel(g_ref, w2_ref, b2_ref, o_ref):
    """out_tile = g_rowtile @ W2_coltile + b2_coltile  (embarrassingly parallel)."""
    s = jnp.dot(g_ref[...], w2_ref[...], preferred_element_type=jnp.float32)
    o_ref[...] = (s + b2_ref[...]).astype(o_ref.dtype)


# ----------------------------- helpers ------------------------------------ #

def _round_up(x, m):
    return ((x + m - 1) // m) * m


def _vmem_budget_bytes():
    """~80% of per-core VMEM (generation-aware; conservative fallback = v7x 64 MiB)."""
    cap = None
    try:
        info = pltpu.get_tpu_info()
        for name in ("vmem_capacity_bytes", "vmem_size_bytes", "vmem_bytes"):
            cap = getattr(info, name, None)
            if cap:
                break
    except Exception:
        cap = None
    if not cap:
        cap = 64 << 20  # smallest per-TC VMEM across v5e/v6e/v7x
    return int(cap * 0.8)


def _pick_tile(dim, align, max_tile):
    """Largest multiple-of-`align` divisor of `dim` that is <= max_tile.

    Non-divisible or already-small dims use the full extent (a full-array
    block is exempt from the (8,128) divisibility rule)."""
    if dim % align != 0 or dim <= max_tile:
        return dim
    best = align
    t = align
    while t <= min(dim, max_tile):
        if dim % t == 0:
            best = t
        t += align
    return best


# ----------------------------- forward ------------------------------------ #

def gcn_forward(adj, w1, b1, w2, b2):
    """out = adj @ (relu(adj @ W1 + b1) @ W2) + b2, as two pallas_calls."""
    n = adj.shape[0]
    e = w1.shape[1]
    f = w2.shape[1]
    assert adj.shape == (n, n) and w1.shape == (n, e)
    assert b1.shape == (e,) and w2.shape == (e, f) and b2.shape == (f,)

    # Pad the hidden dim to a lane-dense multiple of 128.  Zero columns of
    # W1/b1 produce h columns of relu(0)=0 and zero rows of W2 contribute
    # nothing, so the result is unchanged while avoiding masked partial stores.
    e_pad = max(128, _round_up(e, 128))
    if e_pad != e:
        w1 = jnp.pad(w1, ((0, 0), (0, e_pad - e)))
        b1 = jnp.pad(b1, (0, e_pad - e))
        w2 = jnp.pad(w2, ((0, e_pad - e), (0, 0)))

    # bf16 MXU inputs (halves HBM/VMEM traffic); accumulation stays f32.
    adj_b = adj.astype(jnp.bfloat16)
    w1_b = w1.astype(jnp.bfloat16)
    w2_b = w2.astype(jnp.bfloat16)
    b1_2d = b1.reshape(1, e_pad).astype(jnp.float32)
    b2_2d = b2.reshape(1, f).astype(jnp.float32)

    vmem_budget = _vmem_budget_bytes()

    # ---- call 1: g = adj @ relu(adj @ W1 + b1)  -> bf16 [n, e_pad] -------- #
    # TODO(synk): for voc_size large enough that the (n, n) bf16 adj no longer
    # fits VMEM (~n >= 4-5K on v7x), stream adj row/K tiles with an f32
    # accumulator instead of keeping adj fully resident.
    vmem1 = 2 * (n * n * 2 + n * e_pad * 2 + e_pad * 4 + n * e_pad * 2)
    vmem1 = int(min(max(vmem1 + (2 << 20), 8 << 20), vmem_budget))
    cost1 = pl.CostEstimate(
        flops=4 * n * n * e_pad,
        transcendentals=0,
        bytes_accessed=n * n * 2 + 2 * n * e_pad * 2 + e_pad * 4,
    )
    g = pl.pallas_call(
        _gcn_g_kernel,
        out_shape=jax.ShapeDtypeStruct((n, e_pad), jnp.bfloat16),
        grid_spec=pltpu.PrefetchScalarGridSpec(
            num_scalar_prefetch=0,
            grid=(1,),
            in_specs=[
                pl.BlockSpec((n, n), lambda i: (0, 0)),       # adj
                pl.BlockSpec((n, e_pad), lambda i: (0, 0)),   # W1
                pl.BlockSpec((1, e_pad), lambda i: (0, 0)),   # b1
            ],
            out_specs=pl.BlockSpec((n, e_pad), lambda i: (0, 0)),
        ),
        compiler_params=pltpu.CompilerParams(
            dimension_semantics=("arbitrary",),
            vmem_limit_bytes=vmem1,
        ),
        cost_estimate=cost1,
    )(adj_b, w1_b, b1_2d)

    # ---- call 2: out = g @ W2 + b2  (row x col 'parallel' grid) ----------- #
    # Keep the output column tile as wide (lane-dense) as possible and tile
    # rows when n grows, instead of shrinking the column tile. Both grid axes
    # are 'parallel' so v7x's second TensorCore can take half the work.
    tn = _pick_tile(f, 128, max(128, (8 << 20) // (e_pad * 2)))
    tm = _pick_tile(n, 8, max(8, (8 << 20) // (tn * 4 + e_pad * 2)))
    grid2 = (n // tm, f // tn)

    # VMEM estimate: only the pipelined per-step blocks are double-buffered.
    vmem2 = 2 * (tm * e_pad * 2 + e_pad * tn * 2 + tn * 4 + tm * tn * 4)
    vmem2 = int(min(max(vmem2 + (2 << 20), 8 << 20), vmem_budget))
    cost2 = pl.CostEstimate(
        flops=2 * n * e_pad * f,
        transcendentals=0,
        bytes_accessed=n * e_pad * 2 + e_pad * f * 2 + f * 4 + n * f * 4,
    )
    return pl.pallas_call(
        _gcn_out_kernel,
        out_shape=jax.ShapeDtypeStruct((n, f), jnp.float32),
        grid_spec=pltpu.PrefetchScalarGridSpec(
            num_scalar_prefetch=0,
            grid=grid2,
            in_specs=[
                pl.BlockSpec((tm, e_pad), lambda i, j: (i, 0)),   # g row tile
                pl.BlockSpec((e_pad, tn), lambda i, j: (0, j)),   # W2 col tile
                pl.BlockSpec((1, tn), lambda i, j: (0, j)),       # b2 col tile
            ],
            out_specs=pl.BlockSpec((tm, tn), lambda i, j: (i, j)),
        ),
        compiler_params=pltpu.CompilerParams(
            dimension_semantics=("parallel", "parallel"),
            vmem_limit_bytes=vmem2,
        ),
        cost_estimate=cost2,
    )(g, w2_b, b2_2d)


# ----------------------------- module wrapper ------------------------------ #

class GCNPallas:
    """JAX/Pallas re-implementation of the PyTorch GCN module's forward pass.

    forward(adj_arg):
        h   = relu( adj @ (eye(voc) @ W1) + b1 )
        h   = dropout(h)                      # identity at inference
        out = adj @ (h @ W2) + b2             # out_features hard-coded to 768
        return out                            # [voc_size, 768]
    Like the PyTorch module, `self.adj` (constructor adjacency) is used in the
    matmuls; the `adj` argument to forward is ignored.
    """

    GCN2_OUT = 768  # hard-coded in the reference module

    def __init__(self, voc_size, emb_dim, adj, key):
        self.voc_size = voc_size
        self.emb_dim = emb_dim
        self.adj = adj.astype(jnp.float32)
        # Kept only for the pure-jnp reference; the kernel exploits x == eye.
        self.x = jnp.eye(voc_size, dtype=jnp.float32)

        k1, k2, k3, k4 = jax.random.split(key, 4)
        # GraphConvolution.reset_parameters: uniform(-stdv, stdv), stdv = 1/sqrt(out)
        stdv1 = 1.0 / (emb_dim ** 0.5)
        self.w1 = jax.random.uniform(
            k1, (voc_size, emb_dim), jnp.float32, -stdv1, stdv1)
        self.b1 = jax.random.uniform(
            k2, (emb_dim,), jnp.float32, -stdv1, stdv1)

        stdv2 = 1.0 / (self.GCN2_OUT ** 0.5)
        self.w2 = jax.random.uniform(
            k3, (emb_dim, self.GCN2_OUT), jnp.float32, -stdv2, stdv2)
        self.b2 = jax.random.uniform(
            k4, (self.GCN2_OUT,), jnp.float32, -stdv2, stdv2)

    def __call__(self, adj_arg):
        return gcn_forward(self.adj, self.w1, self.b1, self.w2, self.b2)


# ----------------------------- references ---------------------------------- #

def _reference_f32(model):
    """Pure-f32 jnp reference of the original forward (including eye @ W1)."""
    h = jnp.maximum(model.adj @ (model.x @ model.w1) + model.b1, 0.0)
    return model.adj @ (h @ model.w2) + model.b2


def _reference_bf16(model):
    """Reference that mimics the kernel's bf16-in / f32-accumulate arithmetic."""
    bf = jnp.bfloat16
    adj_b = model.adj.astype(bf)
    s1 = jnp.dot(adj_b, model.w1.astype(bf), preferred_element_type=jnp.float32)
    h = jnp.maximum(s1 + model.b1, 0.0).astype(bf)
    g = jnp.dot(adj_b, h, preferred_element_type=jnp.float32).astype(bf)
    return jnp.dot(g, model.w2.astype(bf),
                   preferred_element_type=jnp.float32) + model.b2


if __name__ == "__main__":
    key = jax.random.PRNGKey(0)
    k_adj, k_params = jax.random.split(key)

    voc_size = 32   # small, multiple of 8 (sublane)
    emb_dim = 64    # small hidden dim (padded to 128 lanes inside the wrapper)

    # Deterministic synthetic adjacency (dense, symmetric, non-negative).
    a = jax.random.uniform(k_adj, (voc_size, voc_size), jnp.float32)
    adj = (a + a.T) * 0.5

    model = GCNPallas(voc_size, emb_dim, adj, k_params)

    out = model(adj)              # forward(adj) — arg ignored, as in PyTorch
    out = jax.block_until_ready(out)

    assert out.shape == (voc_size, GCNPallas.GCN2_OUT)
    # Tight check against a reference with identical bf16-in/f32-acc casts.
    ref_bf16 = _reference_bf16(model)
    assert jnp.allclose(out, ref_bf16, atol=1e-3, rtol=1e-3)
    # Loose check against the pure-f32 math of the original module.
    ref_f32 = _reference_f32(model)
    assert jnp.allclose(out, ref_f32, atol=2e-2, rtol=2e-2)

    print("KERNEL_OK")
</pallas_src>

<mosaic_0001>
module attributes {stable_mosaic.version = 11 : i64} {
  func.func @_gcn_g_kernel(%arg0: i32, %arg1: memref<32x32xbf16, #tpu.memory_space<vmem>>, %arg2: memref<32x128xbf16, #tpu.memory_space<vmem>>, %arg3: memref<1x128xf32, #tpu.memory_space<vmem>>, %arg4: memref<32x128xbf16, #tpu.memory_space<vmem>>) attributes {dimension_semantics = [#tpu.dimension_semantics<arbitrary>], iteration_bounds = array<i64: 1>, scalar_prefetch = 0 : i64, scratch_operands = 0 : i64, tpu.core_type = #tpu.core_type<tc>, window_params = [{pipeline_mode = #tpu.pipeline_mode<synchronous>, transform_indices = @transform_0, window_bounds = array<i64: 32, 32>}, {pipeline_mode = #tpu.pipeline_mode<synchronous>, transform_indices = @transform_1, window_bounds = array<i64: 32, 128>}, {pipeline_mode = #tpu.pipeline_mode<synchronous>, transform_indices = @transform_2, window_bounds = array<i64: 1, 128>}, {pipeline_mode = #tpu.pipeline_mode<synchronous>, transform_indices = @transform_3, window_bounds = array<i64: 32, 128>}]} {
    %c0 = arith.constant 0 : index
    %c0_0 = arith.constant 0 : index
    %0 = vector.load %arg1[%c0, %c0_0] : memref<32x32xbf16, #tpu.memory_space<vmem>>, vector<32x32xbf16>
    %c0_1 = arith.constant 0 : index
    %c0_2 = arith.constant 0 : index
    %1 = vector.load %arg2[%c0_1, %c0_2] : memref<32x128xbf16, #tpu.memory_space<vmem>>, vector<32x128xbf16>
    %cst = arith.constant dense<0.000000e+00> : vector<32x128xf32>
    %2 = tpu.matmul %0, %1, %cst {dimension_numbers = #tpu.dot_dimension_numbers<[1], [0], [0], [1], [0, 0, 1, 1], [], []>} : vector<32x32xbf16>, vector<32x128xbf16>, vector<32x128xf32> -> vector<32x128xf32>
    %c0_3 = arith.constant 0 : index
    %c0_4 = arith.constant 0 : index
    %3 = vector.load %arg3[%c0_3, %c0_4] : memref<1x128xf32, #tpu.memory_space<vmem>>, vector<1x128xf32>
    %4 = vector.broadcast %3 : vector<1x128xf32> to vector<32x128xf32>
    %5 = arith.addf %2, %4 : vector<32x128xf32>
    %cst_5 = arith.constant 0.000000e+00 : f32
    %6 = vector.broadcast %cst_5 : f32 to vector<32x128xf32>
    %7 = arith.maximumf %5, %6 : vector<32x128xf32>
    %c0_6 = arith.constant 0 : index
    %c0_7 = arith.constant 0 : index
    %8 = vector.load %arg1[%c0_6, %c0_7] : memref<32x32xbf16, #tpu.memory_space<vmem>>, vector<32x32xbf16>
    %9 = arith.truncf %7 : vector<32x128xf32> to vector<32x128xbf16>
    %cst_8 = arith.constant dense<0.000000e+00> : vector<32x128xf32>
    %10 = tpu.matmul %8, %9, %cst_8 {dimension_numbers = #tpu.dot_dimension_numbers<[1], [0], [0], [1], [0, 0, 1, 1], [], []>} : vector<32x32xbf16>, vector<32x128xbf16>, vector<32x128xf32> -> vector<32x128xf32>
    %11 = arith.truncf %10 : vector<32x128xf32> to vector<32x128xbf16>
    %c0_9 = arith.constant 0 : index
    %c0_10 = arith.constant 0 : index
    %12 = vector.load %arg4[%c0_9, %c0_10] : memref<32x128xbf16, #tpu.memory_space<vmem>>, vector<32x128xbf16>
    tpu.vector_store %arg4[%c0_9, %c0_10], %11 {strides = array<i32>} : memref<32x128xbf16, #tpu.memory_space<vmem>>, vector<32x128xbf16>,
    return
  }
  func.func @transform_0(%arg0: i32) -> (i32, i32) {
    %c0_i32 = arith.constant 0 : i32
    %c0_i32_0 = arith.constant 0 : i32
    %c0_i32_1 = arith.constant 0 : i32
    return %c0_i32, %c0_i32_0 : i32, i32
  }
  func.func @transform_1(%arg0: i32) -> (i32, i32) {
    %c0_i32 = arith.constant 0 : i32
    %c0_i32_0 = arith.constant 0 : i32
    %c0_i32_1 = arith.constant 0 : i32
    return %c0_i32, %c0_i32_0 : i32, i32
  }
  func.func @transform_2(%arg0: i32) -> (i32, i32) {
    %c0_i32 = arith.constant 0 : i32
    %c0_i32_0 = arith.constant 0 : i32
    %c0_i32_1 = arith.constant 0 : i32
    return %c0_i32, %c0_i32_0 : i32, i32
  }
  func.func @transform_3(%arg0: i32) -> (i32, i32) {
    %c0_i32 = arith.constant 0 : i32
    %c0_i32_0 = arith.constant 0 : i32
    %c0_i32_1 = arith.constant 0 : i32
    return %c0_i32, %c0_i32_0 : i32, i32
  }
}

</mosaic_0001>

<bundles_post_ra>
// kernel: tpu_custom_call.1
= control target key start
LH: loop header
LB: loop body
LE: loop exit
PB: predicated region body
PF: predicated region fallthrough
CT: control target
= control target key end

     0   :  { %8 = vsyncpa [#allocation3], 0  ;;  %s440_s0 = inlined_call_operand.hbm [shape: bf16[32,32], index: 0, kind: input, shape index: {}]   ;;  %s441_s1 = inlined_call_operand.hbm [shape: bf16[32,128], index: 1, kind: input, shape index: {}]   ;;  %s442_s2 = inlined_call_operand.vmem [shape: f32[1,128], index: 2, kind: input, shape index: {}]   ;;  %s443_s3 = inlined_call_operand.hbm [shape: bf16[32,128], index: 3, kind: output, shape index: {}]  }
   0x1   :  { %9 = vsyncpa [#allocation6], 0 }
   0x2   :  { %10 = vsyncpa [#allocation4], 0  ;;  %s363_s12 = smov [#allocation2]   ;;  %s291_s16 = scalar_lea.hbm %s440_s0, 256 }
   0x3   :  { %s16_s13 = sshll.u32 %s363_s12, 4  ;;  %p292_p0 = scmp.ne.s32.totalorder %s440_s0, %s291_s16  ;;  %s17_s13 = int_to_ptr.vmem [resolvable:$true] %s16_s13 }
   0x4   :  { %p295_p1 = scmp.lt.u32.totalorder %s291_s16, %s440_s0 }
   0x6   :  { %p297_p2 = pnand %p295_p1, %p292_p0 }
   0x8   :  { %300 = shalt.err (!%p297_p2)
}
   0x9   :  { %s301_s21 = scalar_lea.vmem %s17_s13, 256  ;;  %p306_p4 = scmp.lt.s32.totalorder %s17_s13, %s17_s13 }
   0xa   :  { %p302_p3 = scmp.ne.s32.totalorder %s17_s13, %s301_s21  ;;  %p307_p5 = scmp.lt.s32.totalorder %s301_s21, %s301_s21 }
   0xc   :  { %p308_p6 = por %p307_p5, %p306_p4 }
   0xe   :  { %p309_p7 = pnand %p308_p6, %p302_p3 }
  0x10   :  { %312 = shalt.err (!%p309_p7)
}
  0x11   :  { %s364_s22 = smov 64   ;;  %s365_s23 = smov 4  }
  0x12   :  { %22 = dma.hbm_to_vmem [thread:$0]  %s440_s0, 256, %s17_s13, [#allocation3], %s364_s22, %s364_s22, %s365_s23  }
  0x13   :  { %s366_s26 = smov [#allocation5]   ;;  %s313_s30 = scalar_lea.hbm %s441_s1, 256 }
  0x14   :  { %s28_s27 = sshll.u32 %s366_s26, 4  ;;  %p314_p8 = scmp.ne.s32.totalorder %s441_s1, %s313_s30  ;;  %s29_s27 = int_to_ptr.vmem [resolvable:$true] %s28_s27 }
  0x15   :  { %p317_p9 = scmp.lt.u32.totalorder %s313_s30, %s441_s1 }
  0x17   :  { %p319_p10 = pnand %p317_p9, %p314_p8 }
  0x19   :  { %322 = shalt.err (!%p319_p10)
}
  0x1a   :  { %s323_s8 = scalar_lea.vmem %s29_s27, 256  ;;  %p328_p12 = scmp.lt.s32.totalorder %s29_s27, %s29_s27 }
  0x1b   :  { %p324_p11 = scmp.ne.s32.totalorder %s29_s27, %s323_s8  ;;  %p329_p13 = scmp.lt.s32.totalorder %s323_s8, %s323_s8 }
  0x1d   :  { %p330_p0 = por %p329_p13, %p328_p12 }
  0x1f   :  { %p331_p1 = pnand %p330_p0, %p324_p11 }
  0x21   :  { %334 = shalt.err (!%p331_p1)
}
  0x22   :  { %34 = dma.hbm_to_vmem [thread:$0]  %s441_s1, 256, %s29_s27, [#allocation6], %s364_s22, %s364_s22, %s365_s23  }
  0x23   :  { %357 = dma.done.wait [#allocation3], 256  }
  0x24   :  { %358 = vsyncadd [#allocation3], 4294967040 }
  0x25   :  { %359 = dma.done.wait [#allocation6], 256  }
  0x26   :  { %360 = vsyncadd [#allocation6], 4294967040  ;;  %v287_v0 = vld [vmem:[#allocation5] sm:$0xff]   ;;  %v288_v1 = vld [vmem:[#allocation5 + $0x8] sm:$0xff]   ;;  %vm81_vm0 = vcmask 261120  }
  0x27   :  { %266 = vmatprep.subr.bf16.mxu0 %v287_v0  ;;  %v289_v2 = vld [vmem:[#allocation2] sm:$0xff]   ;;  %v290_v3 = vld [vmem:[#allocation2 + $0x8] sm:$0xff]  }
  0x28   :  { %267 = vmatpush3.bf16.msra.mxu0 %v287_v0  ;;  %270 = vmatprep.mubr.msk.bf16.mxu0 %vm81_vm0, %v289_v2  ;;  %v230_v4 = vld [vmem:[%s442_s2] ss:$0 sm:$0xff]  ;;  %s367_s2 = smov [#allocation7]  }
  0x29   :  { %268 = vmatprep.subr.bf16.mxu0 %v288_v1  ;;  %278 = vmatprep.mubr.msk.bf16.mxu1 %vm81_vm0, %v289_v2  ;;  %s217_s11 = sshll.u32 %s367_s2, 4  ;;  %s218_s11 = int_to_ptr.vmem [resolvable:$true] %s217_s11 }
  0x2a   :  { %s335_s12 = scalar_lea.vmem %s218_s11, 256  ;;  %p340_p3 = scmp.lt.s32.totalorder %s218_s11, %s218_s11 }
  0x2b   :  { %p336_p2 = scmp.ne.s32.totalorder %s218_s11, %s335_s12  ;;  %p341_p4 = scmp.lt.s32.totalorder %s335_s12, %s335_s12 }
  0x2c   :  { %269 = vmatpush3.bf16.msra.mxu0 %v288_v1 }
  0x2d   :  { %p342_p5 = por %p341_p4, %p340_p3 }
  0x2f   :  { %271 = vmatmul.mubr.msk.bf16.vlgmr.msra.gmra.mrb[0].mxu0 %vm81_vm0, %v290_v3  ;;  %p343_p6 = pnand %p342_p5, %p336_p2 }
 0x102   :  { %v272_v5 = vpop.f32.mrb[0].mxu0 }
 0x103   :  { %v131_v6 = vadd.f32 %v272_v5, %v230_v4  ;;  %v122_v7 = vpop.f32.mrb[1].mxu0 }
 0x104   :  { %v123_v8 = vadd.f32 %v230_v4, %v122_v7  ;;  %v273_v9 = vpop.f32.mrb[2].mxu0 }
 0x105   :  { %v134_v10 = vadd.f32 %v273_v9, %v230_v4  ;;  %v125_v11 = vpop.f32.mrb[3].mxu0  ;;  %v139_v13 = vmax.f32 %v131_v6, 0.0 }
 0x106   :  { %v126_v12 = vadd.f32 %v230_v4, %v125_v11  ;;  %v137_v15 = vmax.f32 %v123_v8, 0.0 }
 0x107   :  { %v140_v14 = vmax.f32 %v134_v10, 0.0 }
 0x108   :  { %v138_v16 = vmax.f32 %v126_v12, 0.0 }
 0x109   :  { %v142_v17 = vpack.c.bf16 %v140_v14, %v139_v13 }
 0x10a   :  { %v141_v18 = vpack.c.bf16 %v138_v16, %v137_v15 }
 0x10c   :  { %274 = vmatprep.subr.bf16.mxu1 %v141_v18 }
 0x10d   :  { %275 = vmatpush3.bf16.msra.mxu1 %v141_v18 }
 0x10e   :  { %276 = vmatprep.subr.bf16.mxu1 %v142_v17 }
 0x111   :  { %277 = vmatpush3.bf16.msra.mxu1 %v142_v17 }
 0x114   :  { %279 = vmatmul.mubr.msk.bf16.vlgmr.msra.gmra.mrb[0].mxu1 %vm81_vm0, %v290_v3 }
 0x1e7   :  { %v280_v19 = vpop.f32.mrb[0].mxu1 }
 0x1e8   :  { %v177_v20 = vpop.f32.mrb[1].mxu1 }
 0x1e9   :  { %v281_v21 = vpop.f32.mrb[2].mxu1 }
 0x1ea   :  { %v255_v22 = vpack.c.bf16 %v281_v21, %v280_v19  ;;  %v180_v23 = vpop.f32.mrb[3].mxu1 }
 0x1eb   :  { %v250_v24 = vpack.c.bf16 %v180_v23, %v177_v20 }
 0x1ec   :  { %257 = vst [vmem:[#allocation7 + $0x8] sm:$0xff] %v255_v22  }
 0x1ed   :  { %251 = vst [vmem:[#allocation7] sm:$0xff] %v250_v24  }
 0x1ee   :  { %346 = shalt.err (!%p343_p6)
}
 0x1ef   :  { %s347_s15 = scalar_lea.hbm %s443_s3, 256 }
 0x1f0   :  { %p348_p7 = scmp.ne.s32.totalorder %s443_s3, %s347_s15  ;;  %p351_p8 = scmp.lt.u32.totalorder %s347_s15, %s443_s3 }
 0x1f2   :  { %p353_p9 = pnand %p351_p8, %p348_p7 }
 0x1f4   :  { %356 = shalt.err (!%p353_p9)
}
 0x1f5   :  { %223 = dma.vmem_to_hbm [thread:$0]  %s218_s11, 256, %s443_s3, [#allocation4], %s364_s22, %s364_s22, %s365_s23  }
 0x1f6   :  { %361 = dma.done.wait [#allocation4], 256  }
 0x1f7   :  { %362 = vsyncadd [#allocation4], 4294967040 }
 0x1f8   :  { %227 = vsyncpa [#allocation3], 1 }
 0x1f9   :  { %228 = vsyncpa [#allocation6], 1 }
 0x1fa   :  { %229 = vsyncpa [#allocation4], 1 }

</bundles_post_ra>
